<compile_context>
chip_gen: v5e
topology: v5e:2x2
jax: 0.10.0
libtpu: 0.0.40
codegen_flags: <defaults>
</compile_context>

<pallas_src>
import math
import functools

import jax
import jax.numpy as jnp
from jax import lax
from jax.experimental import pallas as pl
from jax.experimental.pallas import tpu as pltpu

_NEG_LARGE = -1e30  # finite "minus infinity" (no inf arithmetic / NaN risk)


# --------------------------------------------------------------------------
# Pass 1: QKV projection (scale folded into Wq), head-grouped output layout.
# --------------------------------------------------------------------------
def _qkv_proj_kernel(x_ref, wq_ref, wk_ref, wv_ref, bq_ref, bk_ref, bv_ref,
                     q_out, k_out, v_out):
    # x_ref: (tp, D) mxu_dtype; w*_ref: (D, G*dh) mxu_dtype; b*_ref: (1, G*dh) f32
    # outputs: (tp, G*dh) mxu_dtype
    x = x_ref[...]
    q_out[...] = (jnp.dot(x, wq_ref[...], preferred_element_type=jnp.float32)
                  + bq_ref[...]).astype(q_out.dtype)
    k_out[...] = (jnp.dot(x, wk_ref[...], preferred_element_type=jnp.float32)
                  + bk_ref[...]).astype(k_out.dtype)
    v_out[...] = (jnp.dot(x, wv_ref[...], preferred_element_type=jnp.float32)
                  + bv_ref[...]).astype(v_out.dtype)


# --------------------------------------------------------------------------
# Pass 2: flash attention (online softmax) + fused output projection.
# --------------------------------------------------------------------------
def _flash_attn_kernel(q_ref, k_ref, v_ref, wo_ref, bo_ref, o_ref,
                       m_scr, l_scr, acc_scr, out_scr,
                       *, causal, tq, tkv, dh, g_heads, mxu_dtype, exact_recip):
    # Block shapes seen by the kernel:
    #   q_ref : (tq,  G*dh)   k_ref/v_ref: (tkv, G*dh)
    #   wo_ref: (G, dh, D)    bo_ref: (1, D)      o_ref: (tq, D)
    # Scratch:
    #   m_scr/l_scr: (G, tq, 1)   acc_scr: (G, tq, dh)   out_scr: (tq, D)
    qi = pl.program_id(1)
    gi = pl.program_id(2)
    ki = pl.program_id(3)
    n_g = pl.num_programs(2)
    n_k = pl.num_programs(3)
    neg = jnp.float32(_NEG_LARGE)

    # per-(batch, q-tile): zero the cross-group output accumulator
    @pl.when(jnp.logical_and(gi == 0, ki == 0))
    def _init_out():
        out_scr[...] = jnp.zeros_like(out_scr)

    # per-(batch, q-tile, head-group): init online-softmax state
    @pl.when(ki == 0)
    def _init_group():
        m_scr[...] = jnp.full_like(m_scr, neg)
        l_scr[...] = jnp.zeros_like(l_scr)
        acc_scr[...] = jnp.zeros_like(acc_scr)

    def _attend(apply_mask):
        q_blk = q_ref[...]            # (tq,  G*dh) mxu_dtype
        k_blk = k_ref[...]            # (tkv, G*dh)
        v_blk = v_ref[...]            # (tkv, G*dh)
        if apply_mask:
            row = qi * tq + lax.broadcasted_iota(jnp.int32, (tq, tkv), 0)
            col = ki * tkv + lax.broadcasted_iota(jnp.int32, (tq, tkv), 1)
            bias = jnp.where(col > row, neg, jnp.float32(0.0))
        for h in range(g_heads):       # static unroll over heads in the group
            sl = slice(h * dh, (h + 1) * dh)
            # Q.K^T without an explicit transpose (contract last axes).
            s = lax.dot_general(q_blk[:, sl], k_blk[:, sl],
                                dimension_numbers=(((1,), (1,)), ((), ())),
                                preferred_element_type=jnp.float32)   # (tq, tkv)
            if apply_mask:
                s = s + bias
            m_prev = m_scr[h]                                         # (tq, 1)
            m_new = jnp.maximum(m_prev, jnp.max(s, axis=-1, keepdims=True))
            alpha = jnp.exp(m_prev - m_new)
            p = jnp.exp(s - m_new)                                    # unnormalized
            l_scr[h] = alpha * l_scr[h] + jnp.sum(p, axis=-1, keepdims=True)
            acc_scr[h] = alpha * acc_scr[h] + jnp.dot(
                p.astype(mxu_dtype), v_blk[:, sl],
                preferred_element_type=jnp.float32)
            m_scr[h] = m_new

    if causal:
        attended = (ki * tkv) <= (qi * tq + (tq - 1))        # not fully above diag
        straddles = (ki * tkv + (tkv - 1)) > (qi * tq)       # needs the mask

        @pl.when(jnp.logical_and(attended, straddles))
        def _attend_masked():
            _attend(apply_mask=True)

        @pl.when(jnp.logical_and(attended, jnp.logical_not(straddles)))
        def _attend_unmasked():
            _attend(apply_mask=False)
    else:
        _attend(apply_mask=False)

    # per-group finalize: normalize and fold in this group's out-projection
    @pl.when(ki == n_k - 1)
    def _finalize_group():
        for h in range(g_heads):
            inv_l = pl.reciprocal(l_scr[h], approx=not exact_recip)
            o_h = (acc_scr[h] * inv_l).astype(mxu_dtype)              # (tq, dh)
            out_scr[...] = out_scr[...] + jnp.dot(
                o_h, wo_ref[h], preferred_element_type=jnp.float32)

    # last group, last kv tile: add output bias once and write the tile
    @pl.when(jnp.logical_and(ki == n_k - 1, gi == n_g - 1))
    def _write_out():
        o_ref[...] = (out_scr[...] + bo_ref[...]).astype(o_ref.dtype)


def _pick_tile(s, target, mult):
    """Largest multiple-of-`mult` divisor of s not exceeding target (or s)."""
    if s <= target:
        return s
    t = (target // mult) * mult
    while t >= mult:
        if s % t == 0:
            return t
        t -= mult
    return s  # fallback: whole sequence (block == full dim is always legal)


def self_attention(x, w_in, b_in, w_out, b_out, *, n_heads,
                   causal_mask=False, q_tile=128, kv_tile=256, proj_tile=256,
                   mxu_dtype=jnp.bfloat16,
                   vmem_limit_bytes=48 * 1024 * 1024):
    """Multi-head self-attention matching PyTorch SelfAttention.forward.

    x: (B, S, D). w_in: (D, 3D) in (in, out) layout. w_out: (D, D) (in, out).
    mxu_dtype: operand dtype for all matmuls (default bf16; f32 accumulation).
    Per-generation tuning: v5e/v6e (128 MiB VMEM) can raise vmem_limit_bytes to
    ~96 MiB and use q_tile=256 / kv_tile=512; v7x (64 MiB/TC) keep <=48 MiB.
    """
    B, S, D = x.shape
    if D % n_heads != 0:
        raise ValueError(f"d_embed={D} must be divisible by n_heads={n_heads}")
    H = n_heads
    dh = D // H
    mxu_dtype = jnp.dtype(mxu_dtype)
    exact_recip = mxu_dtype == jnp.dtype(jnp.float32)

    # Head grouping: pack G heads per grid step so the lane axis is ~128 wide.
    G = max(1, min(H, 128 // dh)) if dh <= 128 else 1
    while H % G != 0:
        G -= 1
    HG = H // G
    Gdh = G * dh

    # ---- host-side prep: cast x once, fold 1/sqrt(dh) into Wq, group heads ----
    scale = 1.0 / math.sqrt(dh)
    x_m = x.astype(mxu_dtype)
    w_q = w_in[:, :D] * scale
    w_k = w_in[:, D:2 * D]
    w_v = w_in[:, 2 * D:]
    wq_g = w_q.reshape(D, HG, Gdh).transpose(1, 0, 2).astype(mxu_dtype)
    wk_g = w_k.reshape(D, HG, Gdh).transpose(1, 0, 2).astype(mxu_dtype)
    wv_g = w_v.reshape(D, HG, Gdh).transpose(1, 0, 2).astype(mxu_dtype)
    bq_g = (b_in[:D] * scale).reshape(HG, 1, Gdh).astype(jnp.float32)
    bk_g = b_in[D:2 * D].reshape(HG, 1, Gdh).astype(jnp.float32)
    bv_g = b_in[2 * D:].reshape(HG, 1, Gdh).astype(jnp.float32)
    wo_g = w_out.reshape(HG, G, dh, D).astype(mxu_dtype)
    bo2 = b_out.reshape(1, D).astype(jnp.float32)

    mult = 8 if mxu_dtype.itemsize >= 4 else 16
    tq = _pick_tile(S, q_tile, mult)
    tkv = _pick_tile(S, kv_tile, mult)
    tp = _pick_tile(S, proj_tile, mult)
    nq, nk, nsp = S // tq, S // tkv, S // tp

    cparams = pltpu.CompilerParams(
        dimension_semantics=("parallel", "parallel", "arbitrary"),
        vmem_limit_bytes=vmem_limit_bytes)

    # ---------------- Pass 1: projection to (B, HG, S, G*dh) ----------------
    qkv_shape = jax.ShapeDtypeStruct((B, HG, S, Gdh), mxu_dtype)
    q_p, k_p, v_p = pl.pallas_call(
        _qkv_proj_kernel,
        out_shape=(qkv_shape, qkv_shape, qkv_shape),
        grid_spec=pltpu.PrefetchScalarGridSpec(
            num_scalar_prefetch=0,
            grid=(B, nsp, HG),
            in_specs=[
                pl.BlockSpec((None, tp, D), lambda b, s, g: (b, s, 0)),     # x
                pl.BlockSpec((None, D, Gdh), lambda b, s, g: (g, 0, 0)),    # Wq
                pl.BlockSpec((None, D, Gdh), lambda b, s, g: (g, 0, 0)),    # Wk
                pl.BlockSpec((None, D, Gdh), lambda b, s, g: (g, 0, 0)),    # Wv
                pl.BlockSpec((None, 1, Gdh), lambda b, s, g: (g, 0, 0)),    # bq
                pl.BlockSpec((None, 1, Gdh), lambda b, s, g: (g, 0, 0)),    # bk
                pl.BlockSpec((None, 1, Gdh), lambda b, s, g: (g, 0, 0)),    # bv
            ],
            out_specs=[
                pl.BlockSpec((None, None, tp, Gdh), lambda b, s, g: (b, g, s, 0)),
                pl.BlockSpec((None, None, tp, Gdh), lambda b, s, g: (b, g, s, 0)),
                pl.BlockSpec((None, None, tp, Gdh), lambda b, s, g: (b, g, s, 0)),
            ],
        ),
        compiler_params=cparams,
    )(x_m, wq_g, wk_g, wv_g, bq_g, bk_g, bv_g)

    # ---------------- Pass 2: flash attention + out-projection ----------------
    if causal_mask:
        # Clamp skipped kv tiles to the last needed tile so their DMA is elided.
        def kv_map(b, q, g, k):
            last = (q * tq + (tq - 1)) // tkv
            return (b, g, jnp.minimum(k, last), 0)
    else:
        def kv_map(b, q, g, k):
            return (b, g, k, 0)

    kernel = functools.partial(
        _flash_attn_kernel, causal=bool(causal_mask), tq=tq, tkv=tkv, dh=dh,
        g_heads=G, mxu_dtype=mxu_dtype, exact_recip=exact_recip)

    return pl.pallas_call(
        kernel,
        out_shape=jax.ShapeDtypeStruct((B, S, D), x.dtype),
        grid_spec=pltpu.PrefetchScalarGridSpec(
            num_scalar_prefetch=0,
            grid=(B, nq, HG, nk),
            in_specs=[
                pl.BlockSpec((None, None, tq, Gdh),
                             lambda b, q, g, k: (b, g, q, 0)),              # Q
                pl.BlockSpec((None, None, tkv, Gdh), kv_map),               # K
                pl.BlockSpec((None, None, tkv, Gdh), kv_map),               # V
                pl.BlockSpec((None, G, dh, D),
                             lambda b, q, g, k: (g, 0, 0, 0)),              # Wo
                pl.BlockSpec((1, D), lambda b, q, g, k: (0, 0)),            # bo
            ],
            out_specs=pl.BlockSpec((None, tq, D), lambda b, q, g, k: (b, q, 0)),
            scratch_shapes=[
                pltpu.VMEM((G, tq, 1), jnp.float32),   # m (running max)
                pltpu.VMEM((G, tq, 1), jnp.float32),   # l (running denom)
                pltpu.VMEM((G, tq, dh), jnp.float32),  # acc (P@V accumulator)
                pltpu.VMEM((tq, D), jnp.float32),      # out (cross-group out-proj)
            ],
        ),
        compiler_params=pltpu.CompilerParams(
            dimension_semantics=("parallel", "parallel", "arbitrary", "arbitrary"),
            vmem_limit_bytes=vmem_limit_bytes),
    )(q_p, k_p, v_p, wo_g, bo2)


def self_attention_ref(x, w_in, b_in, w_out, b_out, *, n_heads, causal_mask=False):
    """Pure-JAX reference matching the PyTorch forward pass (f32)."""
    B, S, D = x.shape
    d_head = D // n_heads
    qkv = x @ w_in + b_in
    q, k, v = jnp.split(qkv, 3, axis=-1)
    q = q.reshape(B, S, n_heads, d_head).transpose(0, 2, 1, 3)
    k = k.reshape(B, S, n_heads, d_head).transpose(0, 2, 1, 3)
    v = v.reshape(B, S, n_heads, d_head).transpose(0, 2, 1, 3)
    w = q @ jnp.swapaxes(k, -1, -2)
    if causal_mask:
        mask = jnp.triu(jnp.ones((S, S), dtype=bool), 1)
        w = jnp.where(mask[None, None], -jnp.inf, w)
    w = w / math.sqrt(d_head)
    w = jax.nn.softmax(w, axis=-1)
    out = w @ v
    out = out.transpose(0, 2, 1, 3).reshape(B, S, D)
    return out @ w_out + b_out


if __name__ == "__main__":
    # Small shapes consistent with the module: batch=2, d_embed=32, heads=4.
    B, D, H = 2, 32, 4

    key = jax.random.PRNGKey(0)
    kx, kwi, kbi, kwo, kbo, kx2 = jax.random.split(key, 6)

    lim = 1.0 / math.sqrt(D)
    w_in = jax.random.uniform(kwi, (D, 3 * D), minval=-lim, maxval=lim,
                              dtype=jnp.float32)
    b_in = jax.random.uniform(kbi, (3 * D,), minval=-lim, maxval=lim,
                              dtype=jnp.float32)
    w_out = jax.random.uniform(kwo, (D, D), minval=-lim, maxval=lim,
                               dtype=jnp.float32)
    b_out = jax.random.uniform(kbo, (D,), minval=-lim, maxval=lim,
                               dtype=jnp.float32)

    # --- case 1: seq=8 (single-tile path), causal and non-causal ---
    S1 = 8
    x1 = jax.random.normal(kx, (B, S1, D), dtype=jnp.float32)
    # Exact f32 MXU path (bit-accuracy check vs reference).
    out1 = jax.block_until_ready(
        self_attention(x1, w_in, b_in, w_out, b_out, n_heads=H,
                       causal_mask=False, mxu_dtype=jnp.float32))
    out1c = jax.block_until_ready(
        self_attention(x1, w_in, b_in, w_out, b_out, n_heads=H,
                       causal_mask=True, mxu_dtype=jnp.float32))
    ref1 = self_attention_ref(x1, w_in, b_in, w_out, b_out, n_heads=H,
                              causal_mask=False)
    ref1c = self_attention_ref(x1, w_in, b_in, w_out, b_out, n_heads=H,
                               causal_mask=True)
    assert jnp.allclose(out1, ref1, atol=1e-4, rtol=1e-4)
    assert jnp.allclose(out1c, ref1c, atol=1e-4, rtol=1e-4)
    # Default bf16 MXU path (performance mode).
    out1b = jax.block_until_ready(
        self_attention(x1, w_in, b_in, w_out, b_out, n_heads=H,
                       causal_mask=True))
    assert jnp.allclose(out1b, ref1c, atol=3e-2, rtol=3e-2)

    # --- case 2: seq=256 with explicit q/kv tiling (multi-tile online softmax,
    #     causal tile skipping / DMA clamping / mask-only-on-straddle paths) ---
    S2 = 256
    x2 = jax.random.normal(kx2, (B, S2, D), dtype=jnp.float32)
    out2 = jax.block_until_ready(
        self_attention(x2, w_in, b_in, w_out, b_out, n_heads=H,
                       causal_mask=False, q_tile=64, kv_tile=128,
                       mxu_dtype=jnp.float32))
    out2c = jax.block_until_ready(
        self_attention(x2, w_in, b_in, w_out, b_out, n_heads=H,
                       causal_mask=True, q_tile=64, kv_tile=128,
                       mxu_dtype=jnp.float32))
    ref2 = self_attention_ref(x2, w_in, b_in, w_out, b_out, n_heads=H,
                              causal_mask=False)
    ref2c = self_attention_ref(x2, w_in, b_in, w_out, b_out, n_heads=H,
                               causal_mask=True)
    assert jnp.allclose(out2, ref2, atol=1e-4, rtol=1e-4)
    assert jnp.allclose(out2c, ref2c, atol=1e-4, rtol=1e-4)
    # Default bf16 path on the multi-tile causal case.
    out2b = jax.block_until_ready(
        self_attention(x2, w_in, b_in, w_out, b_out, n_heads=H,
                       causal_mask=True, q_tile=64, kv_tile=128))
    assert jnp.allclose(out2b, ref2c, atol=3e-2, rtol=3e-2)

    print("KERNEL_OK")
</pallas_src>

<mosaic_0001>
module attributes {stable_mosaic.version = 11 : i64} {
  func.func @_qkv_proj_kernel(%arg0: i32, %arg1: i32, %arg2: i32, %arg3: memref<1x8x32xf32, #tpu.memory_space<vmem>>, %arg4: memref<1x32x32xf32, #tpu.memory_space<vmem>>, %arg5: memref<1x32x32xf32, #tpu.memory_space<vmem>>, %arg6: memref<1x32x32xf32, #tpu.memory_space<vmem>>, %arg7: memref<1x1x32xf32, #tpu.memory_space<vmem>>, %arg8: memref<1x1x32xf32, #tpu.memory_space<vmem>>, %arg9: memref<1x1x32xf32, #tpu.memory_space<vmem>>, %arg10: memref<1x1x8x32xf32, #tpu.memory_space<vmem>>, %arg11: memref<1x1x8x32xf32, #tpu.memory_space<vmem>>, %arg12: memref<1x1x8x32xf32, #tpu.memory_space<vmem>>) attributes {dimension_semantics = [#tpu.dimension_semantics<parallel>, #tpu.dimension_semantics<parallel>, #tpu.dimension_semantics<arbitrary>], iteration_bounds = array<i64: 2, 1, 1>, scalar_prefetch = 0 : i64, scratch_operands = 0 : i64, tpu.core_type = #tpu.core_type<tc>, window_params = [{transform_indices = @transform_0, window_bounds = array<i64: 1, 8, 32>}, {transform_indices = @transform_1, window_bounds = array<i64: 1, 32, 32>}, {transform_indices = @transform_2, window_bounds = array<i64: 1, 32, 32>}, {transform_indices = @transform_3, window_bounds = array<i64: 1, 32, 32>}, {transform_indices = @transform_4, window_bounds = array<i64: 1, 1, 32>}, {transform_indices = @transform_5, window_bounds = array<i64: 1, 1, 32>}, {transform_indices = @transform_6, window_bounds = array<i64: 1, 1, 32>}, {transform_indices = @transform_7, window_bounds = array<i64: 1, 1, 8, 32>}, {transform_indices = @transform_8, window_bounds = array<i64: 1, 1, 8, 32>}, {transform_indices = @transform_9, window_bounds = array<i64: 1, 1, 8, 32>}]} {
    %c0 = arith.constant 0 : index
    %c0_0 = arith.constant 0 : index
    %c0_1 = arith.constant 0 : index
    %0 = vector.load %arg3[%c0, %c0_0, %c0_1] : memref<1x8x32xf32, #tpu.memory_space<vmem>>, vector<1x8x32xf32>
    %1 = vector.shape_cast %0 : vector<1x8x32xf32> to vector<8x32xf32>
    %c0_2 = arith.constant 0 : index
    %c0_3 = arith.constant 0 : index
    %c0_4 = arith.constant 0 : index
    %2 = vector.load %arg4[%c0_2, %c0_3, %c0_4] : memref<1x32x32xf32, #tpu.memory_space<vmem>>, vector<1x32x32xf32>
    %3 = vector.shape_cast %2 : vector<1x32x32xf32> to vector<32x32xf32>
    %cst = arith.constant dense<0.000000e+00> : vector<8x32xf32>
    %4 = tpu.matmul %1, %3, %cst {dimension_numbers = #tpu.dot_dimension_numbers<[1], [0], [0], [1], [0, 0, 1, 1], [], []>} : vector<8x32xf32>, vector<32x32xf32>, vector<8x32xf32> -> vector<8x32xf32>
    %c0_5 = arith.constant 0 : index
    %c0_6 = arith.constant 0 : index
    %c0_7 = arith.constant 0 : index
    %5 = vector.load %arg7[%c0_5, %c0_6, %c0_7] : memref<1x1x32xf32, #tpu.memory_space<vmem>>, vector<1x1x32xf32>
    %6 = vector.shape_cast %5 : vector<1x1x32xf32> to vector<1x32xf32>
    %7 = vector.broadcast %6 : vector<1x32xf32> to vector<8x32xf32>
    %8 = arith.addf %4, %7 : vector<8x32xf32>
    %c0_8 = arith.constant 0 : index
    %c0_9 = arith.constant 0 : index
    %c0_10 = arith.constant 0 : index
    %c0_11 = arith.constant 0 : index
    %9 = vector.load %arg10[%c0_8, %c0_9, %c0_10, %c0_11] : memref<1x1x8x32xf32, #tpu.memory_space<vmem>>, vector<1x1x8x32xf32>
    %10 = vector.shape_cast %9 : vector<1x1x8x32xf32> to vector<8x32xf32>
    %11 = vector.shape_cast %8 : vector<8x32xf32> to vector<1x1x8x32xf32>
    tpu.vector_store %arg10[%c0_8, %c0_9, %c0_10, %c0_11], %11 {strides = array<i32>} : memref<1x1x8x32xf32, #tpu.memory_space<vmem>>, vector<1x1x8x32xf32>,
    %c0_12 = arith.constant 0 : index
    %c0_13 = arith.constant 0 : index
    %c0_14 = arith.constant 0 : index
    %12 = vector.load %arg5[%c0_12, %c0_13, %c0_14] : memref<1x32x32xf32, #tpu.memory_space<vmem>>, vector<1x32x32xf32>
    %13 = vector.shape_cast %12 : vector<1x32x32xf32> to vector<32x32xf32>
    %cst_15 = arith.constant dense<0.000000e+00> : vector<8x32xf32>
    %14 = tpu.matmul %1, %13, %cst_15 {dimension_numbers = #tpu.dot_dimension_numbers<[1], [0], [0], [1], [0, 0, 1, 1], [], []>} : vector<8x32xf32>, vector<32x32xf32>, vector<8x32xf32> -> vector<8x32xf32>
    %c0_16 = arith.constant 0 : index
    %c0_17 = arith.constant 0 : index
    %c0_18 = arith.constant 0 : index
    %15 = vector.load %arg8[%c0_16, %c0_17, %c0_18] : memref<1x1x32xf32, #tpu.memory_space<vmem>>, vector<1x1x32xf32>
    %16 = vector.shape_cast %15 : vector<1x1x32xf32> to vector<1x32xf32>
    %17 = vector.broadcast %16 : vector<1x32xf32> to vector<8x32xf32>
    %18 = arith.addf %14, %17 : vector<8x32xf32>
    %c0_19 = arith.constant 0 : index
    %c0_20 = arith.constant 0 : index
    %c0_21 = arith.constant 0 : index
    %c0_22 = arith.constant 0 : index
    %19 = vector.load %arg11[%c0_19, %c0_20, %c0_21, %c0_22] : memref<1x1x8x32xf32, #tpu.memory_space<vmem>>, vector<1x1x8x32xf32>
    %20 = vector.shape_cast %19 : vector<1x1x8x32xf32> to vector<8x32xf32>
    %21 = vector.shape_cast %18 : vector<8x32xf32> to vector<1x1x8x32xf32>
    tpu.vector_store %arg11[%c0_19, %c0_20, %c0_21, %c0_22], %21 {strides = array<i32>} : memref<1x1x8x32xf32, #tpu.memory_space<vmem>>, vector<1x1x8x32xf32>,
    %c0_23 = arith.constant 0 : index
    %c0_24 = arith.constant 0 : index
    %c0_25 = arith.constant 0 : index
    %22 = vector.load %arg6[%c0_23, %c0_24, %c0_25] : memref<1x32x32xf32, #tpu.memory_space<vmem>>, vector<1x32x32xf32>
    %23 = vector.shape_cast %22 : vector<1x32x32xf32> to vector<32x32xf32>
    %cst_26 = arith.constant dense<0.000000e+00> : vector<8x32xf32>
    %24 = tpu.matmul %1, %23, %cst_26 {dimension_numbers = #tpu.dot_dimension_numbers<[1], [0], [0], [1], [0, 0, 1, 1], [], []>} : vector<8x32xf32>, vector<32x32xf32>, vector<8x32xf32> -> vector<8x32xf32>
    %c0_27 = arith.constant 0 : index
    %c0_28 = arith.constant 0 : index
    %c0_29 = arith.constant 0 : index
    %25 = vector.load %arg9[%c0_27, %c0_28, %c0_29] : memref<1x1x32xf32, #tpu.memory_space<vmem>>, vector<1x1x32xf32>
    %26 = vector.shape_cast %25 : vector<1x1x32xf32> to vector<1x32xf32>
    %27 = vector.broadcast %26 : vector<1x32xf32> to vector<8x32xf32>
    %28 = arith.addf %24, %27 : vector<8x32xf32>
    %c0_30 = arith.constant 0 : index
    %c0_31 = arith.constant 0 : index
    %c0_32 = arith.constant 0 : index
    %c0_33 = arith.constant 0 : index
    %29 = vector.load %arg12[%c0_30, %c0_31, %c0_32, %c0_33] : memref<1x1x8x32xf32, #tpu.memory_space<vmem>>, vector<1x1x8x32xf32>
    %30 = vector.shape_cast %29 : vector<1x1x8x32xf32> to vector<8x32xf32>
    %31 = vector.shape_cast %28 : vector<8x32xf32> to vector<1x1x8x32xf32>
    tpu.vector_store %arg12[%c0_30, %c0_31, %c0_32, %c0_33], %31 {strides = array<i32>} : memref<1x1x8x32xf32, #tpu.memory_space<vmem>>, vector<1x1x8x32xf32>,
    return
  }
  func.func @transform_0(%arg0: i32, %arg1: i32, %arg2: i32) -> (i32, i32, i32) {
    %c0_i32 = arith.constant 0 : i32
    %c0_i32_0 = arith.constant 0 : i32
    return %arg0, %arg1, %c0_i32 : i32, i32, i32
  }
  func.func @transform_1(%arg0: i32, %arg1: i32, %arg2: i32) -> (i32, i32, i32) {
    %c0_i32 = arith.constant 0 : i32
    %c0_i32_0 = arith.constant 0 : i32
    %c0_i32_1 = arith.constant 0 : i32
    return %arg2, %c0_i32, %c0_i32_0 : i32, i32, i32
  }
  func.func @transform_2(%arg0: i32, %arg1: i32, %arg2: i32) -> (i32, i32, i32) {
    %c0_i32 = arith.constant 0 : i32
    %c0_i32_0 = arith.constant 0 : i32
    %c0_i32_1 = arith.constant 0 : i32
    return %arg2, %c0_i32, %c0_i32_0 : i32, i32, i32
  }
  func.func @transform_3(%arg0: i32, %arg1: i32, %arg2: i32) -> (i32, i32, i32) {
    %c0_i32 = arith.constant 0 : i32
    %c0_i32_0 = arith.constant 0 : i32
    %c0_i32_1 = arith.constant 0 : i32
    return %arg2, %c0_i32, %c0_i32_0 : i32, i32, i32
  }
  func.func @transform_4(%arg0: i32, %arg1: i32, %arg2: i32) -> (i32, i32, i32) {
    %c0_i32 = arith.constant 0 : i32
    %c0_i32_0 = arith.constant 0 : i32
    %c0_i32_1 = arith.constant 0 : i32
    return %arg2, %c0_i32, %c0_i32_0 : i32, i32, i32
  }
  func.func @transform_5(%arg0: i32, %arg1: i32, %arg2: i32) -> (i32, i32, i32) {
    %c0_i32 = arith.constant 0 : i32
    %c0_i32_0 = arith.constant 0 : i32
    %c0_i32_1 = arith.constant 0 : i32
    return %arg2, %c0_i32, %c0_i32_0 : i32, i32, i32
  }
  func.func @transform_6(%arg0: i32, %arg1: i32, %arg2: i32) -> (i32, i32, i32) {
    %c0_i32 = arith.constant 0 : i32
    %c0_i32_0 = arith.constant 0 : i32
    %c0_i32_1 = arith.constant 0 : i32
    return %arg2, %c0_i32, %c0_i32_0 : i32, i32, i32
  }
  func.func @transform_7(%arg0: i32, %arg1: i32, %arg2: i32) -> (i32, i32, i32, i32) {
    %c0_i32 = arith.constant 0 : i32
    %c0_i32_0 = arith.constant 0 : i32
    return %arg0, %arg2, %arg1, %c0_i32 : i32, i32, i32, i32
  }
  func.func @transform_8(%arg0: i32, %arg1: i32, %arg2: i32) -> (i32, i32, i32, i32) {
    %c0_i32 = arith.constant 0 : i32
    %c0_i32_0 = arith.constant 0 : i32
    return %arg0, %arg2, %arg1, %c0_i32 : i32, i32, i32, i32
  }
  func.func @transform_9(%arg0: i32, %arg1: i32, %arg2: i32) -> (i32, i32, i32, i32) {
    %c0_i32 = arith.constant 0 : i32
    %c0_i32_0 = arith.constant 0 : i32
    return %arg0, %arg2, %arg1, %c0_i32 : i32, i32, i32, i32
  }
}

</mosaic_0001>

<bundles_post_ra>
// kernel: tpu_custom_call.1
= control target key start
LH: loop header
LB: loop body
LE: loop exit
PB: predicated region body
PF: predicated region fallthrough
CT: control target
= control target key end

     0   :  { %s1611_s0 = inlined_call_operand.hbm [shape: f32[2,8,32], index: 0, kind: input, shape index: {}]   ;;  %s1612_s1 = inlined_call_operand.hbm [shape: f32[1,32,32], index: 1, kind: input, shape index: {}]   ;;  %s1613_s2 = inlined_call_operand.hbm [shape: f32[1,32,32], index: 2, kind: input, shape index: {}]   ;;  %s1614_s3 = inlined_call_operand.hbm [shape: f32[1,32,32], index: 3, kind: input, shape index: {}]   ;;  %s1615_s4 = inlined_call_operand.vmem [shape: f32[1,1,32], index: 4, kind: input, shape index: {}]   ;;  %s1616_s5 = inlined_call_operand.vmem [shape: f32[1,1,32], index: 5, kind: input, shape index: {}]   ;;  %s1617_s6 = inlined_call_operand.vmem [shape: f32[1,1,32], index: 6, kind: input, shape index: {}]   ;;  %s1618_s7 = inlined_call_operand.hbm [shape: f32[2,1,8,32], index: 7, kind: output, shape index: {0}]   ;;  %s1619_s8 = inlined_call_operand.hbm [shape: f32[2,1,8,32], index: 8, kind: output, shape index: {1}]   ;;  %s1620_s9 = inlined_call_operand.hbm [shape: f32[2,1,8,32], index: 9, kind: output, shape index: {2}]  }
   0x1   :  { %1626 = sst [smem:[#allocation22_spill]] %s1611_s0 }
   0x2   :  { %1627 = sst [smem:[#allocation23_spill]] %s1612_s1 }
   0x3   :  { %1628 = sst [smem:[#allocation24_spill]] %s1613_s2 }
   0x4   :  { %1629 = sst [smem:[#allocation25_spill]] %s1614_s3 }
   0x5   :  { %15 = vsyncpa [#allocation3], 0 }
   0x6   :  { %17 = vsyncpa [#allocation3 + $0x1], 0 }
   0x7   :  { %18 = vsyncpa [#allocation6], 0 }
   0x8   :  { %19 = vsyncpa [#allocation9], 0 }
   0x9   :  { %20 = vsyncpa [#allocation4], 0 }
   0xa   :  { %22 = vsyncpa [#allocation4 + $0x1], 0 }
   0xb   :  { %23 = vsyncpa [#allocation12], 0 }
   0xc   :  { %25 = vsyncpa [#allocation12 + $0x1], 0  ;;  %s1358_s30 = smov 0   ;;  %s1360_s10 = smov 0  }
   0xd   :  { %s1362_s11 = smov 0   ;;  %s1364_s12 = smov 0  }
   0xe   :  { %s1366_s13 = smov 0   ;;  %s1368_s14 = smov 0  }
   0xf LB: > { %1630 = sst [smem:[#allocation19_spill]] %s1297_s13  ;;  %s1389_s15 = sadd.s32 4294967295, %s1301_s14   ;;  %s1301_s14 = sphi %s1368_s14, %s31_s14   ;;  %s1297_s13 = sphi %s1366_s13, %s1648_s13   ;;  %s1293_s12 = sphi %s1364_s12, %s1647_s12   ;;  %s1289_s11 = sphi %s1362_s11, %s1651_s11   ;;  %s1285_s10 = sphi %s1360_s10, %s1650_s10   ;;  %s1281_s30 = sphi %s1358_s30, %s1649_s30  }
  0x10   : > { %p894_p0 = scmp.ge.s32.totalorder %s1301_s14, 1  ;;  %p73_p1 = scmp.eq.s32.totalorder %s1389_s15, 0 }
  0x11   : > { %p329_p2 = scmp.lt.s32.totalorder %s1301_s14, 3  ;;  %s1631_s1 = sld [smem:[#allocation23_spill]] }
  0x12   : > { %s1303_s20 = smov [#allocation5]   ;;  %p901_p6 = scmp.ge.s32.totalorder %s1301_s14, 2 }
  0x13   : > { %p1397_p3 = pnand %p894_p0, %p329_p2  ;;  %s345_s21 = sshll.u32 %s1303_s20, 4  ;;  %s346_s21 = int_to_ptr.vmem [resolvable:$true] %s345_s21 }
  0x14   : > { %s1634_s2 = sld [smem:[#allocation24_spill]]  ;;  %s1304_s26 = smov 128  }
  0x15   : > { %p943_p4 = pneg %p1397_p3  ;;  %s1305_s27 = smov 8  }
  0x16   : > { %s1306_s28 = smov [#allocation7]   ;;  %s1635_s3 = sld [smem:[#allocation25_spill]] }
  0x17   : > { %s343_s18 = sshll.u32 %s1631_s1, 4  ;;  %p1405_p5 = pnand %p943_p4, %p73_p1  ;;  %s344_s18 = int_to_ptr.hbm [resolvable:$true] %s343_s18 }
  0x18   : > { %s362_s29 = sshll.u32 %s1306_s28, 4  ;;  %s1307_s23 = smov [#allocation8]   ;;  %s363_s29 = int_to_ptr.vmem [resolvable:$true] %s362_s29 }
  0x19   : > { %946 = dma.hbm_to_vmem [thread:$0]  (!%p1405_p5), %s344_s18, 512, %s346_s21, [#allocation6], %s1304_s26, %s1304_s26, %s1305_s27  }
  0x1a   : > { %s360_s25 = sshll.u32 %s1634_s2, 4  ;;  %s379_s24 = sshll.u32 %s1307_s23, 4  ;;  %s361_s25 = int_to_ptr.hbm [resolvable:$true] %s360_s25  ;;  %s380_s24 = int_to_ptr.vmem [resolvable:$true] %s379_s24 }
  0x1b   : > { %949 = dma.hbm_to_vmem [thread:$0]  (!%p1405_p5), %s361_s25, 512, %s363_s29, [#allocation6], %s1304_s26, %s1304_s26, %s1305_s27  }
  0x1c   : > { %s377_s20 = sshll.u32 %s1635_s3, 4  ;;  %s1621_s18 = sadd.s32 4294967294, %s1301_s14   ;;  %s378_s20 = int_to_ptr.hbm [resolvable:$true] %s377_s20 }
  0x1d   : > { %952 = dma.hbm_to_vmem [thread:$0]  (!%p1405_p5), %s378_s20, 512, %s380_s24, [#allocation9], %s1304_s26, %s1304_s26, %s1305_s27  }
  0x1e   : > { %s50_s21 = sadd.s32 1, %s1297_s13  ;;  %s59_s28 = sadd.s32 1, %s1289_s11 }
  0x1f   : > { %p52_p7 = scmp.ge.s32.totalorder %s50_s21, 2  ;;  %p66_p8 = scmp.ne.s32.totalorder %s1289_s11, %s1285_s10 }
  0x20   : > { %p67_p9 = scmp.eq.s32.totalorder %s1301_s14, 0  ;;  %p72_p10 = scmp.ne.s32.totalorder %s1285_s10, %s1281_s30 }
  0x21   : > { %s1653_s21 = smov (%p52_p7, %s50_s21), 0  ;;  %p256_p13 = scmp.eq.s32.totalorder %s1389_s15, 1 }
  0x22   : > { %1636 = sst [smem:[#allocation20_spill]] %s1653_s21  ;;  %p1432_p11 = por %p67_p9, %p66_p8 }
  0x23   : > { %p1438_p12 = por %p73_p1, %p72_p10  ;;  %s54_s26 = ssub.s32 %s1297_s13, %s1653_s21 }
  0x24   : > { %p57_p0 = scmp.eq.s32.totalorder %s54_s26, 0  ;;  %p262_p2 = scmp.eq.s32.totalorder %s1621_s18, 1 }
  0x25   : > { %p1447_p4 = por %p256_p13, %p66_p8  ;;  %p970_p5 = scmp.lt.s32.totalorder %s1301_s14, 2 }
  0x26   : > { %s1453_s29 = scalar_select %p57_p0, %s1289_s11, %s59_s28  }
  0x27   : > { %p1455_p7 = por %p262_p2, %p72_p10  ;;  %s411_s17 = sand.u32 1, %s1289_s11  }
  0x28   : > { %s902_s20 = sshll.u32 %s411_s17, 3  ;;  %s903_s23 = sshll.u32 %s1297_s13, 3 }
  0x29   : > { %s1641_s0 = sld [smem:[#allocation22_spill]]  ;;  %s415_s2 = scalar_lea.vmem [#allocation2], %s902_s20 }
  0x2a   : > { %s424_s18 = sshll.u32 %s415_s2, 4  ;;  %p954_p8 = pnand %p970_p5, %p1432_p11  ;;  %s425_s18 = int_to_ptr.vmem [resolvable:$true] %s424_s18 }
  0x2b   : > { %s412_s28 = scalar_lea.sflag [#allocation3], %s411_s17 }
  0x2d   : > { %433 = sbr.rel (%p1397_p3) target bundleno = 222 (0xde), region = 48 }
  0x2f   : > { %s420_s26 = scalar_lea.hbm %s1641_s0, %s903_s23 }
  0x30   : > { %s422_s3 = sshll.u32 %s420_s26, 4  ;;  %s423_s3 = int_to_ptr.hbm [resolvable:$true] %s422_s3 }
  0x31   : > { %956 = dma.hbm_to_vmem [thread:$0]  (!%p954_p8), %s423_s3, 128, %s425_s18, %s412_s28  }
  0x32   : > { %s1469_s21 = sand.u32 1, %s1285_s10  }
  0x33   : > { %s1472_s1 = sshll.u32 %s1469_s21, 3  ;;  %s436_s2 = scalar_lea.sflag [#allocation3], %s1469_s21 }
  0x34   : > { %s439_s20 = scalar_lea.vmem [#allocation2], %s1472_s1 }
  0x35   : > { %1260 = dma.done.wait (%p1438_p12), %s436_s2, 128  }
  0x36   : > { %1262 = vsyncadd (%p1438_p12), %s436_s2, 4294967168 }
  0x37   : > { %1264 = dma.done.wait (%p73_p1), [#allocation6], 1024  }
  0x38   : > { %1266 = vsyncadd (%p73_p1), [#allocation6], 4294966272 }
  0x39   : > { %1268 = dma.done.wait (%p73_p1), [#allocation9], 512  }
  0x3a   : > { %1270 = vsyncadd (%p73_p1), [#allocation9], 4294966784  ;;  %v584_v0 = vld [vmem:[#allocation8 + $0x18] sm:$0xff]  ;;  %v583_v1 = vld [vmem:[#allocation8 + $0x10] sm:$0xff]  ;;  %vm527_vm0 = vcmask 261120   ;;  %s918_s3 = sshll.u32 %s1293_s12, 3 }
  0x3b   : > { %601 = vmatpush.msra.mxu2 %v584_v0  ;;  %v555_v2 = vld [vmem:[#allocation7 + $0x18] sm:$0xff]  ;;  %v582_v4 = vld [vmem:[#allocation8 + $0x8] sm:$0xff]  ;;  %v554_v5 = vld [vmem:[#allocation7 + $0x10] sm:$0xff]  ;;  %s615_s19 = sand.u32 1, %s1389_s15   ;;  %s649_s22 = scalar_lea.hbm %s1619_s8, %s918_s3 }
  0x3c   : > { %v522_v3 = vld [vmem:[#allocation5 + $0x18] sm:$0xff]  ;;  %572 = vmatpush.msra.mxu1 %v555_v2  ;;  %v521_v6 = vld [vmem:[#allocation5 + $0x10] sm:$0xff]  ;;  %v553_v7 = vld [vmem:[#allocation7 + $0x8] sm:$0xff]  ;;  %s501_s17 = scalar_lea.vmem [#allocation11], %s1472_s1  ;;  %s633_s28 = scalar_lea.hbm %s1618_s7, %s918_s3 }
  0x3d   : > { %543 = vmatpush.msra.mxu0 %v522_v3  ;;  %602 = vmatpush.msra.mxu2 %v583_v1  ;;  %v520_v8 = vld [vmem:[#allocation5 + $0x8] sm:$0xff]  ;;  %v581_v9 = vld [vmem:[#allocation8] sm:$0xff]  ;;  %v518_v10 = vld [vmem:[%s439_s20] sm:$0xff]  ;;  %s1497_s23 = sshll.u32 %s501_s17, 4  ;;  %s1509_s12 = sshll.u32 %s649_s22, 4  ;;  %s652_s23 = int_to_ptr.vmem [resolvable:$true] %s1497_s23  ;;  %s654_s12 = int_to_ptr.hbm [resolvable:$true] %s1509_s12 }
  0x3e   : > { %573 = vmatpush.msra.mxu1 %v554_v5  ;;  %v552_v11 = vld [vmem:[#allocation7] sm:$0xff]  ;;  %v1028_v13 = vld [vmem:[%s1616_s5] ss:$0 sm:$0xff]  ;;  %s1625_s15 = scalar_lea.vmem [#allocation10], %s1472_s1  ;;  %s1516_s25 = sshll.u32 %s633_s28, 4  ;;  %s638_s25 = int_to_ptr.hbm [resolvable:$true] %s1516_s25 }
  0x3f   : > { %544 = vmatpush.msra.mxu0 %v521_v6  ;;  %603 = vmatpush.msra.mxu2 %v582_v4  ;;  %v519_v12 = vld [vmem:[#allocation5] sm:$0xff]  ;;  %v1029_v14 = vld [vmem:[%s1615_s4] ss:$0 sm:$0xff]  ;;  %s1514_s18 = sshll.u32 %s1625_s15, 4  ;;  %s665_s0 = scalar_lea.hbm %s1620_s9, %s918_s3 }
  0x40   : > { %574 = vmatpush.msra.mxu1 %v553_v7  ;;  %1642 = sst [smem:[#allocation21_spill]] %s1514_s18  ;;  %v1030_v19 = vld [vmem:[%s1617_s6] ss:$0 sm:$0xff]  ;;  %s508_s28 = scalar_lea.vmem [#allocation13], %s1472_s1 }
  0x41   : > { %545 = vmatpush.msra.mxu0 %v520_v8  ;;  %604 = vmatpush.msra.mxu2 %v581_v9  ;;  %s1531_s2 = sshll.u32 %s508_s28, 4  ;;  %s1533_s20 = sshll.u32 %s665_s0, 4  ;;  %s668_s2 = int_to_ptr.vmem [resolvable:$true] %s1531_s2  ;;  %s670_s20 = int_to_ptr.hbm [resolvable:$true] %s1533_s20 }
  0x42   : > { %914 = vmatmul.msk.f32.vlgmr.msra.gmra.mxu2 %vm527_vm0, %v518_v10  ;;  %575 = vmatpush.msra.mxu1 %v552_v11  ;;  %s1535_s3 = scalar_lea.sflag [#allocation12], %s615_s19  ;;  %s1165_s24 = sshra.s32 %s654_s12, 4  ;;  %s1166_s24 = int_to_ptr.hbm [resolvable:$true] %s1165_s24 }
  0x43   : > { %546 = vmatpush.msra.mxu0 %v519_v12  ;;  %913 = vmatmul.msk.f32.vlgmr.msra.gmra.mxu1 %vm527_vm0, %v518_v10  ;;  %s1167_s26 = scalar_lea.hbm %s1166_s24, 8  ;;  %s1171_s18 = scalar_lea.hbm %s1619_s8, 16 }
  0x44   : > { %912 = vmatmul.msk.f32.vlgmr.msra.gmra.mxu0 %vm527_vm0, %v518_v10  ;;  %p1168_p1 = scmp.ne.s32.totalorder %s1166_s24, %s1167_s26  ;;  %p1172_p10 = scmp.lt.s32.totalorder %s1166_s24, %s1619_s8 }
  0x45   : > { %p1173_p11 = scmp.lt.s32.totalorder %s1171_s18, %s1167_s26 }
  0x46   : > { %p1169_p3 = pnand %p1168_p1, %p1447_p4 }
  0x47   : > { %p1174_p12 = por %p1173_p11, %p1172_p10 }
  0x48   : > { %p1170_p9 = pneg %p1169_p3 }
  0x4a   : > { %p1175_p13 = pnand %p1174_p12, %p1170_p9 }
  0xc0   : > { %v577_v15 = vpop.f32.mrf.mxu1 }
  0xc1   : > { %v578_v16 = vadd.f32 %v1028_v13, %v577_v15  ;;  %v548_v17 = vpop.f32.mrf.mxu0 }
  0xc2   : > { %v549_v18 = vadd.f32 %v1029_v14, %v548_v17 }
  0xc3   : > { %580 = vst.msk [vmem:[%s501_s17] sm:$0xff] %vm527_vm0, %v578_v16 }
  0xc4   : > { %1178 = shalt.err (!%p1175_p13)
}
  0xc5   : > { %938 = dma.vmem_to_hbm [thread:$0]  (%p1447_p4), %s652_s23, 128, %s654_s12, %s1535_s3   ;;  %v606_v20 = vpop.f32.mrf.mxu2 }
  0xc6   : > { %s1643_s19 = scalar_lea.vmem [#allocation10], %s1472_s1  ;;  %s611_s15 = scalar_lea.sflag [#allocation4], %s1469_s21 }
  0xc7   : > { %551 = vst.msk [vmem:[%s1643_s19] sm:$0xff] %vm527_vm0, %v549_v18  ;;  %s1193_s18 = sshra.s32 %s638_s25, 4  ;;  %s1199_s13 = scalar_lea.hbm %s1618_s7, 16  ;;  %s1194_s18 = int_to_ptr.hbm [resolvable:$true] %s1193_s18 }
  0xc8   : > { %s1195_s0 = scalar_lea.hbm %s1194_s18, 8  ;;  %p1200_p8 = scmp.lt.s32.totalorder %s1194_s18, %s1618_s7 }
  0xc9   : > { %p1196_p0 = scmp.ne.s32.totalorder %s1194_s18, %s1195_s0  ;;  %p1201_p1 = scmp.lt.s32.totalorder %s1199_s13, %s1195_s0 }
  0xcb   : > { %p1197_p2 = pnand %p1196_p0, %p1447_p4  ;;  %p1202_p3 = por %p1201_p1, %p1200_p8 }
  0xcd   : > { %p1198_p5 = pneg %p1197_p2 }
  0xcf   : > { %p1203_p9 = pnand %p1202_p3, %p1198_p5 }
  0xd1   : > { %1206 = shalt.err (!%p1203_p9)
}
  0xd2   : > { %s1644_s21 = sld [smem:[#allocation21_spill]]  ;;  %v607_v21 = vadd.f32 %v1030_v19, %v606_v20  ;;  %s1221_s12 = sshra.s32 %s670_s20, 4  ;;  %s1222_s12 = int_to_ptr.hbm [resolvable:$true] %s1221_s12 }
  0xd3   : > { %s1223_s19 = scalar_lea.hbm %s1222_s12, 8  ;;  %s1227_s24 = scalar_lea.hbm %s1620_s9, 16 }
  0xd4   : > { %609 = vst.msk [vmem:[%s508_s28] sm:$0xff] %vm527_vm0, %v607_v21  ;;  %p1224_p10 = scmp.ne.s32.totalorder %s1222_s12, %s1223_s19  ;;  %p1228_p13 = scmp.lt.s32.totalorder %s1222_s12, %s1620_s9 }
  0xd5   : > { %p1229_p0 = scmp.lt.s32.totalorder %s1227_s24, %s1223_s19 }
  0xd6   : > { %p1225_p11 = pnand %p1224_p10, %p1447_p4 }
  0xd7   : > { %p1230_p2 = por %p1229_p0, %p1228_p13 }
  0xd8   : > { %s1645_s23 = int_to_ptr.vmem [resolvable:$true] %s1644_s21  ;;  %p1226_p12 = pneg %p1225_p11 }
  0xd9   : > { %937 = dma.vmem_to_hbm [thread:$0]  (%p1447_p4), %s1645_s23, 128, %s638_s25, %s611_s15  }
  0xda   : > { %p1231_p5 = pnand %p1230_p2, %p1226_p12 }
  0xdc   : > { %1234 = shalt.err (!%p1231_p5)
}
  0xdd   : > { %939 = dma.vmem_to_hbm [thread:$0]  (%p1447_p4), %s668_s2, 128, %s670_s20, %s1535_s3  }
  0xde PF: > { %s681_s1 = sand.u32 1, %s1281_s30   ;;  %p958_p8 = pnand %p901_p6, %p1455_p7 }
  0xdf   : > { %s682_s25 = scalar_lea.sflag [#allocation4], %s681_s1 }
  0xe0   : > { %p959_p1 = pneg %p958_p8 }
  0xe2   : > { %1272 = dma.done.wait (%p959_p1), %s682_s25, 128  }
  0xe3   : > { %1274 = vsyncadd (%p959_p1), %s682_s25, 4294967168  ;;  %s1646_s28 = sadd.s32 4294967294, %s1301_s14  }
  0xe4   : > { %s691_s15 = sand.u32 1, %s1646_s28  }
  0xe5   : > { %s692_s22 = scalar_lea.sflag [#allocation12], %s691_s15 }
  0xe6   : > { %1276 = dma.done.wait (%p959_p1), %s692_s22, 256  }
  0xe7   : > { %1278 = vsyncadd (%p959_p1), %s692_s22, 4294967040  ;;  %s31_s14 = sadd.s32 1, %s1301_s14   ;;  %s1647_s12 = sld [smem:[#allocation19_spill]] }
  0xe8   : > { %p28_p4 = scmp.ge.s32.totalorder %s31_s14, 4   ;;  %s1648_s13 = sld [smem:[#allocation20_spill]] }
  0xe9   : > { %s1649_s30 = smov %s1285_s10  ;;  %s1650_s10 = smov %s1289_s11 }
  0xea   : > { %s1651_s11 = smov %s1453_s29  ;;  %30 = sbr.rel (!%p28_p4) target bundleno = 15 (0xf), region = 149 }
  0xef   :  { %708 = vsyncpa [#allocation3], 1 }
  0xf0   :  { %710 = vsyncpa [#allocation3 + $0x1], 1 }
  0xf1   :  { %711 = vsyncpa [#allocation6], 1 }
  0xf2   :  { %712 = vsyncpa [#allocation9], 1 }
  0xf3   :  { %713 = vsyncpa [#allocation4], 1 }
  0xf4   :  { %715 = vsyncpa [#allocation4 + $0x1], 1 }
  0xf5   :  { %716 = vsyncpa [#allocation12], 1 }
  0xf6   :  { %718 = vsyncpa [#allocation12 + $0x1], 1 }

</bundles_post_ra>
